<compile_context>
chip_gen: v7x
topology: tpu7x:2x2x1
jax: 0.10.0
libtpu: 0.0.40
codegen_flags: <defaults>
</compile_context>

<pallas_src>
import functools

import jax
import jax.numpy as jnp
from jax.experimental import pallas as pl
from jax.experimental.pallas import tpu as pltpu


# ---------------------------------------------------------------------------
# Kernel: masked pooling (S-axis accumulator) + projection + L2 normalization
# ---------------------------------------------------------------------------
def _embed_kernel(x_ref, m_ref, w_ref, *outs_and_scratch,
                  save_residuals, seq_len, seq_tile):
    """Blocks: x (TB,TS,H), m (TB,TS,1), w (H,D) resident.
    Outputs: emb (TB,D) [, pooled (TB,H), inv (TB,1)]; scratch acc (TB,H) f32."""
    if save_residuals:
        emb_ref, pooled_ref, inv_ref, acc_ref = outs_and_scratch
    else:
        emb_ref, acc_ref = outs_and_scratch
        pooled_ref = inv_ref = None

    s_id = pl.program_id(1)

    @pl.when(s_id == 0)
    def _init():
        acc_ref[...] = jnp.zeros_like(acc_ref)

    x = x_ref[...]                              # native dtype (bf16 ok) - no full-tile upcast
    m = m_ref[...].astype(x.dtype)              # (TB,TS,1): S on sublanes -> cheap lane broadcast
    masked = x * m
    if seq_len % seq_tile:                      # static: guard the padded tail of the last S block
        s_pos = (jax.lax.broadcasted_iota(jnp.int32, (1, masked.shape[1], 1), 1)
                 + s_id * seq_tile)
        masked = jnp.where(s_pos < seq_len, masked, jnp.zeros((), masked.dtype))
    acc_ref[...] += jnp.sum(masked, axis=1, dtype=jnp.float32)   # f32 accumulation

    @pl.when(s_id == pl.num_programs(1) - 1)
    def _finalize():
        pooled = acc_ref[...]
        # mean -> sum: the 1/mask-count factor cancels under the L2 normalization.
        proj = jnp.dot(pooled, w_ref[...], preferred_element_type=jnp.float32)  # default precision
        sq = jnp.sum(proj * proj, axis=-1, keepdims=True)
        inv = jax.lax.rsqrt(jnp.maximum(sq, jnp.float32(1e-12)))  # EUP; all-zero-mask row -> 0 emb
        emb_ref[...] = (proj * inv).astype(emb_ref.dtype)
        if save_residuals:
            pooled_ref[...] = pooled.astype(pooled_ref.dtype)
            inv_ref[...] = inv.astype(inv_ref.dtype)


# ---------------------------------------------------------------------------
# Generation-aware VMEM budget + tile selection
# ---------------------------------------------------------------------------
def _vmem_limit_bytes():
    cap = 64 * 1024 * 1024                      # conservative default: v7x per-core VMEM
    try:
        info = pltpu.get_tpu_info()
        cap = int(getattr(info, "vmem_capacity_bytes", cap) or cap)
    except Exception:
        pass
    cap = min(max(cap, 32 * 1024 * 1024), 128 * 1024 * 1024)
    return (cap * 3) // 4                       # ~96 MiB on v5e/v6e, ~48 MiB on v7x


def _choose_tiles(B, S, H, D, x_itemsize, m_itemsize, tile_budget, max_tb=256):
    """Pick (tb, ts): tb gives >=2 batch grid steps when B >= 16 (v7x megacore);
    ts is a multiple-of-8 divisor of S (or S itself) sized so the double-buffered
    x / padded mask blocks + output blocks + accumulator fit the VMEM budget."""
    s_cands = [S]
    for ts in range((S // 8) * 8, 7, -8):
        if ts < S and S % ts == 0:
            s_cands.append(ts)
    if S > 8 and s_cands[-1] != 8:
        s_cands.append(8)                       # non-divisor fallback; kernel guards the tail

    def step_bytes(tb, ts):
        x_blk = tb * ts * H * x_itemsize
        m_blk = tb * ts * 128 * m_itemsize      # (tb,ts,1) pads to 128 lanes in VMEM
        out_blk = tb * (D + H + 128) * 4        # emb + pooled + inv output blocks (f32)
        acc = tb * H * 4                        # f32 accumulator scratch
        return 2 * (x_blk + m_blk + out_blk) + acc

    if B < 16:
        tb = B
    else:
        half = -(-B // 2)
        tb = min(max_tb, -(-half // 8) * 8)     # >=2 (usually even) batch steps

    while True:
        for ts in s_cands:
            if step_bytes(tb, ts) <= tile_budget:
                return tb, ts
        if tb <= 8:
            return tb, s_cands[-1]
        tb = max(8, ((tb // 2) // 8) * 8)


def _sanitize_tile(t, full):
    t = int(min(max(t, 1), full))
    if t == full or t % 8 == 0:
        return t
    return max(8, (t // 8) * 8) if full >= 8 else full


# ---------------------------------------------------------------------------
# pallas_call wrapper
# ---------------------------------------------------------------------------
def _embed_pallas(x, mask, w, *, save_residuals, tb=None, ts=None):
    B, S, H = x.shape
    Hw, D = w.shape
    assert Hw == H and mask.shape == (B, S)
    # Lane-dense layouts (unmasked vector stores): pad W / slice outside the kernel
    # for hidden/embed dims that are not multiples of 128.
    assert H % 128 == 0 and D % 128 == 0, "pad hidden/embed dims to multiples of 128"

    mask3 = mask.reshape(B, S, 1)               # S on sublanes inside the kernel

    vmem_limit = _vmem_limit_bytes()
    w_bytes = H * D * w.dtype.itemsize          # resident across the whole grid
    headroom = 6 * 1024 * 1024
    # TODO(synk): tile D with a second "arbitrary" grid axis if the projection weight
    # ever outgrows the resident-VMEM budget (not the case for retrieval heads).
    assert w_bytes + headroom + (2 << 20) <= vmem_limit, "projection weight too large to keep resident"
    tile_budget = vmem_limit - w_bytes - headroom

    tb_auto, ts_auto = _choose_tiles(B, S, H, D, x.dtype.itemsize,
                                     mask3.dtype.itemsize, tile_budget)
    tb = _sanitize_tile(tb if tb is not None else tb_auto, B)
    ts = _sanitize_tile(ts if ts is not None else ts_auto, S)
    grid = (pl.cdiv(B, tb), pl.cdiv(S, ts))     # batch parallel, sequence reduction last

    kernel = functools.partial(_embed_kernel, save_residuals=save_residuals,
                               seq_len=S, seq_tile=ts)

    if save_residuals:
        out_shape = (jax.ShapeDtypeStruct((B, D), jnp.float32),
                     jax.ShapeDtypeStruct((B, H), jnp.float32),
                     jax.ShapeDtypeStruct((B, 1), jnp.float32))
        out_specs = (pl.BlockSpec((tb, D), lambda i, s: (i, 0)),
                     pl.BlockSpec((tb, H), lambda i, s: (i, 0)),
                     pl.BlockSpec((tb, 1), lambda i, s: (i, 0)))
        extra_out_bytes = B * H * 4 + B * 4
    else:
        out_shape = jax.ShapeDtypeStruct((B, D), jnp.float32)
        out_specs = pl.BlockSpec((tb, D), lambda i, s: (i, 0))
        extra_out_bytes = 0

    cost = pl.CostEstimate(
        flops=2 * B * S * H + 2 * B * H * D + 3 * B * D,
        transcendentals=B,
        bytes_accessed=(B * S * H * x.dtype.itemsize
                        + B * S * mask3.dtype.itemsize
                        + w_bytes + B * D * 4 + extra_out_bytes),
    )

    return pl.pallas_call(
        kernel,
        out_shape=out_shape,
        grid_spec=pltpu.PrefetchScalarGridSpec(
            num_scalar_prefetch=0,
            grid=grid,
            in_specs=[
                pl.BlockSpec((tb, ts, H), lambda i, s: (i, s, 0)),
                pl.BlockSpec((tb, ts, 1), lambda i, s: (i, s, 0)),
                pl.BlockSpec((H, D), lambda i, s: (0, 0)),        # weight stays resident
            ],
            out_specs=out_specs,
            scratch_shapes=[pltpu.VMEM((tb, H), jnp.float32)],    # pooled accumulator
        ),
        compiler_params=pltpu.CompilerParams(
            dimension_semantics=("parallel", "arbitrary"),
            vmem_limit_bytes=vmem_limit,
        ),
        cost_estimate=cost,
    )(x, mask3, w)


# ---------------------------------------------------------------------------
# Differentiable wrapper (pallas_call has no AD rule -> custom_vjp)
# ---------------------------------------------------------------------------
def make_embed_fn(tb=None, ts=None):
    @jax.custom_vjp
    def embed(x, mask, w):
        # forward-only variant: no pooled/inv HBM writeback on inference / build_index
        return _embed_pallas(x, mask, w, save_residuals=False, tb=tb, ts=ts)

    def _fwd(x, mask, w):
        emb, pooled, inv = _embed_pallas(x, mask, w, save_residuals=True, tb=tb, ts=ts)
        return emb, (emb, pooled, inv, mask, w, jnp.zeros((), x.dtype))

    def _bwd(res, g):
        emb, pooled, inv, mask, w, x_proto = res
        g = g.astype(jnp.float32)
        inv = inv.astype(jnp.float32)
        proj = emb.astype(jnp.float32) / inv                       # emb = proj * inv  (inv > 0)
        gp = jnp.sum(g * proj, axis=-1, keepdims=True)
        d_proj = g * inv - proj * (gp * inv * inv * inv)
        w32 = w.astype(jnp.float32)
        d_pooled = jnp.dot(d_proj, w32.T)                          # default precision
        d_w = jnp.dot(pooled.astype(jnp.float32).T, d_proj)
        d_x = d_pooled[:, None, :] * mask.astype(jnp.float32)[..., None]
        return (d_x.astype(x_proto.dtype), jnp.zeros_like(mask), d_w.astype(w.dtype))

    embed.defvjp(_fwd, _bwd)
    return embed


# ---------------------------------------------------------------------------
# Module mirror of Embedding_Ret
# ---------------------------------------------------------------------------
class EmbeddingRetPallas:
    """JAX/Pallas mirror of Embedding_Ret.forward.

    forward(token_states, attention_mask, build_index=False):
      * encoder        -> deterministic linear token projection (stand-in)
      * get_embeddings -> masked mean pool + L2 normalize (contriever/gte/nomic path)
      * build_index    -> torch.no_grad analogue via stop_gradient
    Note: all-zero-mask rows yield a zero embedding (matching the reference), not a unit vector.
    """

    def __init__(self, hidden=128, embed_dim=128, seed=0, tb=None, ts=None):
        # TODO(synk): the real module loads a HuggingFace transformer encoder
        # (from_pretrained); that is not expressible as a single Pallas kernel,
        # so a deterministic linear projection stands in for it here.
        key = jax.random.PRNGKey(seed)
        scale = 1.0 / jnp.sqrt(jnp.float32(hidden))
        self.w_enc = jax.random.normal(key, (hidden, embed_dim), jnp.float32) * scale
        self._embed = make_embed_fn(tb, ts)
        self._grad_ckpt = False

    def forward(self, token_states, attention_mask, *, build_index=False):
        mask_f = attention_mask.astype(jnp.bfloat16)   # 0/1 is exact in bf16; halves mask DMA
        if build_index:
            emb = self._embed(jax.lax.stop_gradient(token_states),
                              jax.lax.stop_gradient(mask_f),
                              jax.lax.stop_gradient(self.w_enc))
            return jax.lax.stop_gradient(emb)
        return self._embed(token_states, mask_f, self.w_enc)

    __call__ = forward

    # Parity stubs for the reference module's non-tensor methods.
    def gradient_checkpointing_enable(self):
        self._grad_ckpt = True   # TODO(synk): no deep encoder graph to checkpoint in the stand-in.

    def gradient_checkpointing_disable(self):
        self._grad_ckpt = False

    def save_models(self, save_directory):
        # TODO(synk): no save_pretrained analogue for the synthetic encoder weights.
        del save_directory


# ---------------------------------------------------------------------------
# Pure-JAX reference of the same head (faithful masked *mean* pool + L2 norm).
# The explicit mean division differs from the kernel only by a positive per-row
# scale, which cancels under L2 normalization (values and gradients).
# ---------------------------------------------------------------------------
def _ref_embed(token_states, attention_mask, w):
    m = attention_mask.astype(jnp.float32)
    pooled = jnp.sum(token_states.astype(jnp.float32) * m[:, :, None], axis=1)
    pooled = pooled / jnp.maximum(jnp.sum(m, axis=1, keepdims=True), 1e-9)
    proj = jnp.dot(pooled, w.astype(jnp.float32))
    n2 = jnp.sum(proj * proj, axis=-1, keepdims=True)
    return proj * jax.lax.rsqrt(jnp.maximum(n2, 1e-12))


if __name__ == "__main__":
    # Small shapes; tiles forced to (8, 8) so the grid is (2, 2): exercises batch
    # pipelining, a partial batch block (B=12), and the S-axis accumulator.
    B, S, H, D = 12, 16, 128, 128
    TB, TS = 8, 8
    key = jax.random.PRNGKey(0)
    kx, km, kt = jax.random.split(key, 3)
    token_states = jax.random.normal(kx, (B, S, H), jnp.float32).astype(jnp.bfloat16)
    lengths = jax.random.randint(km, (B,), minval=1, maxval=S + 1)
    attention_mask = (jnp.arange(S)[None, :] < lengths[:, None]).astype(jnp.int32)

    retriever = EmbeddingRetPallas(hidden=H, embed_dim=D, seed=0, tb=TB, ts=TS)

    emb = retriever(token_states, attention_mask)                         # grad path (fwd-only)
    emb_idx = retriever(token_states, attention_mask, build_index=True)   # no-grad index path
    emb = jax.block_until_ready(emb)
    emb_idx = jax.block_until_ready(emb_idx)

    mask_f = attention_mask.astype(jnp.bfloat16)
    ref = _ref_embed(token_states, mask_f, retriever.w_enc)
    assert emb.shape == (B, D) and emb_idx.shape == (B, D)
    assert bool(jnp.allclose(emb, ref, atol=1e-2, rtol=1e-2))
    assert bool(jnp.allclose(emb_idx, ref, atol=1e-2, rtol=1e-2))

    # Gradient check of the differentiable (non-index) path vs. the JAX reference.
    x32 = token_states.astype(jnp.float32)
    tgt = jax.random.normal(kt, (B, D), jnp.float32)
    embed_fn = retriever._embed

    def loss_pallas(x_, w_):
        return jnp.sum(embed_fn(x_, mask_f, w_) * tgt)

    def loss_ref(x_, w_):
        return jnp.sum(_ref_embed(x_, mask_f, w_) * tgt)

    gx, gw = jax.grad(loss_pallas, argnums=(0, 1))(x32, retriever.w_enc)
    gx_r, gw_r = jax.grad(loss_ref, argnums=(0, 1))(x32, retriever.w_enc)
    jax.block_until_ready((gx, gw))
    assert bool(jnp.allclose(gx, gx_r, atol=2e-2, rtol=2e-2))
    assert bool(jnp.allclose(gw, gw_r, atol=2e-2, rtol=2e-2))

    print("KERNEL_OK")
</pallas_src>

<mosaic_0001>
module attributes {stable_mosaic.version = 11 : i64} {
  func.func @_embed_kernel(%arg0: i32, %arg1: i32, %arg2: memref<8x8x128xbf16, #tpu.memory_space<vmem>>, %arg3: memref<8x8x1xbf16, #tpu.memory_space<vmem>>, %arg4: memref<128x128xf32, #tpu.memory_space<vmem>>, %arg5: memref<8x128xf32, #tpu.memory_space<vmem>>, %arg6: memref<8x128xf32, #tpu.memory_space<vmem>>) attributes {dimension_semantics = [#tpu.dimension_semantics<parallel>, #tpu.dimension_semantics<arbitrary>], iteration_bounds = array<i64: 2, 2>, scalar_prefetch = 0 : i64, scratch_operands = 1 : i64, tpu.core_type = #tpu.core_type<tc>, window_params = [{transform_indices = @transform_0, window_bounds = array<i64: 8, 8, 128>}, {transform_indices = @transform_1, window_bounds = array<i64: 8, 8, 1>}, {pipeline_mode = #tpu.pipeline_mode<synchronous>, transform_indices = @transform_2, window_bounds = array<i64: 128, 128>}, {transform_indices = @transform_3, window_bounds = array<i64: 8, 128>}]} {
    %c0_i32 = arith.constant 0 : i32
    %0 = arith.cmpi eq, %arg1, %c0_i32 : i32
    %1 = arith.extui %0 : i1 to i32
    %c0_i32_0 = arith.constant 0 : i32
    %2 = arith.cmpi ne, %1, %c0_i32_0 : i32
    scf.if %2 {
      %cst_11 = arith.constant 0.000000e+00 : f32
      %15 = vector.broadcast %cst_11 : f32 to vector<8x128xf32>
      %c0_12 = arith.constant 0 : index
      %c0_13 = arith.constant 0 : index
      %16 = vector.load %arg6[%c0_12, %c0_13] : memref<8x128xf32, #tpu.memory_space<vmem>>, vector<8x128xf32>
      tpu.vector_store %arg6[%c0_12, %c0_13], %15 {strides = array<i32>} : memref<8x128xf32, #tpu.memory_space<vmem>>, vector<8x128xf32>,
    } else {
    }
    %c0 = arith.constant 0 : index
    %c0_1 = arith.constant 0 : index
    %c0_2 = arith.constant 0 : index
    %3 = vector.load %arg2[%c0, %c0_1, %c0_2] : memref<8x8x128xbf16, #tpu.memory_space<vmem>>, vector<8x8x128xbf16>
    %c0_3 = arith.constant 0 : index
    %c0_4 = arith.constant 0 : index
    %c0_5 = arith.constant 0 : index
    %4 = vector.load %arg3[%c0_3, %c0_4, %c0_5] : memref<8x8x1xbf16, #tpu.memory_space<vmem>>, vector<8x8x1xbf16>
    %5 = vector.broadcast %4 : vector<8x8x1xbf16> to vector<8x8x128xbf16>
    %6 = arith.mulf %3, %5 : vector<8x8x128xbf16>
    %c0_6 = arith.constant 0 : index
    %c0_7 = arith.constant 0 : index
    %7 = vector.load %arg6[%c0_6, %c0_7] : memref<8x128xf32, #tpu.memory_space<vmem>>, vector<8x128xf32>
    %8 = arith.extf %6 : vector<8x8x128xbf16> to vector<8x8x128xf32>
    %cst = arith.constant dense<0.000000e+00> : vector<8x128xf32>
    %9 = vector.multi_reduction <add>, %8, %cst [1] : vector<8x8x128xf32> to vector<8x128xf32>
    %10 = arith.addf %7, %9 : vector<8x128xf32>
    %c0_8 = arith.constant 0 : index
    %c0_9 = arith.constant 0 : index
    %11 = vector.load %arg6[%c0_8, %c0_9] : memref<8x128xf32, #tpu.memory_space<vmem>>, vector<8x128xf32>
    tpu.vector_store %arg6[%c0_8, %c0_9], %10 {strides = array<i32>} : memref<8x128xf32, #tpu.memory_space<vmem>>, vector<8x128xf32>,
    %c1_i32 = arith.constant 1 : i32
    %12 = arith.cmpi eq, %arg1, %c1_i32 : i32
    %13 = arith.extui %12 : i1 to i32
    %c0_i32_10 = arith.constant 0 : i32
    %14 = arith.cmpi ne, %13, %c0_i32_10 : i32
    scf.if %14 {
      %c0_11 = arith.constant 0 : index
      %c0_12 = arith.constant 0 : index
      %15 = vector.load %arg6[%c0_11, %c0_12] : memref<8x128xf32, #tpu.memory_space<vmem>>, vector<8x128xf32>
      %c0_13 = arith.constant 0 : index
      %c0_14 = arith.constant 0 : index
      %16 = vector.load %arg4[%c0_13, %c0_14] : memref<128x128xf32, #tpu.memory_space<vmem>>, vector<128x128xf32>
      %cst_15 = arith.constant dense<0.000000e+00> : vector<8x128xf32>
      %17 = tpu.matmul %15, %16, %cst_15 {dimension_numbers = #tpu.dot_dimension_numbers<[1], [0], [0], [1], [0, 0, 1, 1], [], []>} : vector<8x128xf32>, vector<128x128xf32>, vector<8x128xf32> -> vector<8x128xf32>
      %18 = arith.mulf %17, %17 : vector<8x128xf32>
      %cst_16 = arith.constant dense<0.000000e+00> : vector<8xf32>
      %19 = vector.multi_reduction <add>, %18, %cst_16 [1] : vector<8x128xf32> to vector<8xf32>
      %20 = vector.shape_cast %19 : vector<8xf32> to vector<8x1xf32>
      %cst_17 = arith.constant 9.99999996E-13 : f32
      %21 = vector.broadcast %cst_17 : f32 to vector<8x1xf32>
      %22 = arith.maximumf %20, %21 : vector<8x1xf32>
      %23 = math.rsqrt %22 : vector<8x1xf32>
      %24 = vector.broadcast %23 : vector<8x1xf32> to vector<8x128xf32>
      %25 = arith.mulf %17, %24 : vector<8x128xf32>
      %c0_18 = arith.constant 0 : index
      %c0_19 = arith.constant 0 : index
      %26 = vector.load %arg5[%c0_18, %c0_19] : memref<8x128xf32, #tpu.memory_space<vmem>>, vector<8x128xf32>
      tpu.vector_store %arg5[%c0_18, %c0_19], %25 {strides = array<i32>} : memref<8x128xf32, #tpu.memory_space<vmem>>, vector<8x128xf32>,
    } else {
    }
    return
  }
  func.func @transform_0(%arg0: i32, %arg1: i32) -> (i32, i32, i32) {
    %c0_i32 = arith.constant 0 : i32
    %c0_i32_0 = arith.constant 0 : i32
    return %arg0, %arg1, %c0_i32 : i32, i32, i32
  }
  func.func @transform_1(%arg0: i32, %arg1: i32) -> (i32, i32, i32) {
    %c0_i32 = arith.constant 0 : i32
    %c0_i32_0 = arith.constant 0 : i32
    return %arg0, %arg1, %c0_i32 : i32, i32, i32
  }
  func.func @transform_2(%arg0: i32, %arg1: i32) -> (i32, i32) {
    %c0_i32 = arith.constant 0 : i32
    %c0_i32_0 = arith.constant 0 : i32
    %c0_i32_1 = arith.constant 0 : i32
    return %c0_i32, %c0_i32_0 : i32, i32
  }
  func.func @transform_3(%arg0: i32, %arg1: i32) -> (i32, i32) {
    %c0_i32 = arith.constant 0 : i32
    %c0_i32_0 = arith.constant 0 : i32
    return %arg0, %c0_i32 : i32, i32
  }
}

</mosaic_0001>

<bundles_post_ra>
// kernel: tpu_custom_call.1
= control target key start
LH: loop header
LB: loop body
LE: loop exit
PB: predicated region body
PF: predicated region fallthrough
CT: control target
= control target key end

     0   :  { %s2040_s0 = inlined_call_operand.vmem [shape: bf16[12,16,128], index: 0, kind: input, shape index: {}]   ;;  %s2041_s1 = inlined_call_operand.vmem [shape: bf16[12,16,1], index: 1, kind: input, shape index: {}]   ;;  %s2042_s2 = inlined_call_operand.hbm [shape: f32[128,128], index: 2, kind: input, shape index: {}]   ;;  %s2043_s3 = inlined_call_operand.hbm [shape: f32[12,128], index: 3, kind: output, shape index: {}]  }
   0x1   :  { %2051 = sst [smem:[#allocation16_spill]] %s2040_s0 }
   0x2   :  { %2052 = sst [smem:[#allocation17_spill]] %s2042_s2 }
   0x3   :  { %8 = vsyncpa [#allocation6], 0 }
   0x4   :  { %9 = vsyncpa [#allocation7], 0 }
   0x5   :  { %11 = vsyncpa [#allocation7 + $0x1], 0  ;;  %s1701_s12 = smov 0   ;;  %s1703_s13 = smov 0  }
   0x6   :  { %s1705_s14 = smov 0   ;;  %s1707_s15 = smov 0  }
   0x7   :  { %s1709_s16 = smov 0   ;;  %s1711_s17 = smov 0  }
   0x8   :  { %s1713_s18 = smov 0   ;;  %s1715_s19 = smov 0  }
   0x9   :  { %s1717_s20 = smov 0   ;;  %s1719_s21 = smov 0  }
   0xa LB: > { %2053 = sst [smem:[#allocation11_spill]] %s1577_s14  ;;  %s1031_s22 = sadd.s32 4294967295, %s1605_s21   ;;  %s1605_s21 = sphi %s1719_s21, %s17_s21   ;;  %s1601_s20 = sphi %s1717_s20, %s2090_s20   ;;  %s1597_s19 = sphi %s1715_s19, %s2089_s19   ;;  %s1593_s18 = sphi %s1713_s18, %s2088_s18   ;;  %s1589_s17 = sphi %s1711_s17, %s2087_s17   ;;  %s1585_s16 = sphi %s1709_s16, %s2086_s16   ;;  %s1581_s15 = sphi %s1707_s15, %s2085_s15   ;;  %s1577_s14 = sphi %s1705_s14, %s2079_s14   ;;  %s1573_s13 = sphi %s1703_s13, %s2084_s13   ;;  %s1569_s12 = sphi %s1701_s12, %s2083_s12  }
   0xb   : > { %s1032_s23 = sadd.s32 4294967294, %s1605_s21   ;;  %s26_s24 = sadd.s32 1, %s1597_s19 }
   0xc   : > { %s29_s25 = sadd.s32 1, %s1601_s20  ;;  %p27_p0 = scmp.ge.s32.totalorder %s26_s24, 2 }
   0xd   : > { %s38_s26 = sadd.s32 1, %s1585_s16  ;;  %p45_p1 = scmp.ne.s32.totalorder %s1585_s16, %s1581_s15 }
   0xe   : > { %p46_p2 = scmp.eq.s32.totalorder %s1605_s21, 0  ;;  %s2092_s24 = smov (%p27_p0, %s26_s24), 0 }
   0xf   : > { %2054 = sst [smem:[#allocation12_spill]] %s2092_s24  ;;  %s2094_s25 = smov (!%p27_p0, %s29_s25), %s1601_s20 }
  0x10   : > { %s34_s27 = ssub.s32 %s1597_s19, %s2092_s24  ;;  %p1764_p3 = por %p46_p2, %p45_p1 }
  0x11   : > { %p31_p4 = scmp.ge.s32.totalorder %s2094_s25, 2  ;;  %s113_s29 = sadd.s32 1, %s1577_s14 }
  0x12   : > { %s2055_s28 = scalar_select %p1764_p3, 1, 0 }
  0x13   : > { %p123_p5 = scmp.ne.s32.totalorder %s1577_s14, %s1573_s13  ;;  %p124_p6 = scmp.eq.s32.totalorder %s1031_s22, 3 }
  0x14   : > { %s2096_s25 = smov (%p31_p4, %s2094_s25), 0  ;;  %p129_p8 = scmp.ne.s32.totalorder %s1573_s13, %s1569_s12 }
  0x15   : > { %2056 = sst [smem:[#allocation13_spill]] %s2096_s25  ;;  %p1773_p7 = por %p124_p6, %p123_p5 }
  0x16   : > { %s33_s4 = ssub.s32 %s1601_s20, %s2096_s25  ;;  %p130_p9 = scmp.eq.s32.totalorder %s1032_s23, 3 }
  0x17   : > { %s2057_s30 = scalar_select %p1773_p7, 1, 0 }
  0x18   : > { %s35_s5 = sor.u32 %s34_s27, %s33_s4  ;;  %p111_p10 = scmp.eq.s32.totalorder %s33_s4, 0 }
  0x19   : > { %p36_p11 = scmp.eq.s32.totalorder %s35_s5, 0  ;;  %p1781_p12 = por %p130_p9, %p129_p8 }
  0x1a   : > { %s1786_s7 = scalar_select %p111_p10, %s1577_s14, %s113_s29  }
  0x1b   : > { %s2058_s6 = scalar_select %p1781_p12, 1, 0 }
  0x1c   : > { %2059 = sst [smem:[#allocation14_spill]] %s1786_s7  ;;  %p1033_p13 = scmp.ge.s32.totalorder %s1605_s21, 1 }
  0x1d   : > { %s1789_s8 = scalar_select %p36_p11, %s1585_s16, %s38_s26  }
  0x1e   : > { %p137_p0 = scmp.lt.s32.totalorder %s1605_s21, 5  ;;  %p1793_p1 = scmp.eq.s32.totalorder %s1031_s22, 0 }
  0x1f   : > { %2060 = sst [smem:[#allocation15_spill]] %s1789_s8  ;;  %s1671_s11 = smov [#allocation5]  }
  0x20   : > { %s2061_s9 = scalar_select %p1793_p1, 1, 0 }
  0x21   : > { %p1797_p2 = pnand %p1033_p13, %p137_p0  ;;  %s149_s23 = sshll.u32 %s1671_s11, 4  ;;  %s150_s23 = int_to_ptr.vmem [resolvable:$true] %s149_s23 }
  0x22   : > { %s2064_s2 = sld [smem:[#allocation17_spill]] }
  0x23   : > { %s2062_s10 = scalar_select %p1797_p2, 1, 0 }
  0x24   : > { %p1167_p4 = pneg %p1797_p2 }
  0x26   : > { %p1805_p5 = pnand %p1793_p1, %p1167_p4 }
  0x28   : > { %s1399_s29 = scalar_lea.hbm %s2064_s2, 2048  ;;  %p1401_p8 = pneg %p1805_p5 }
  0x29   : > { %p1400_p6 = scmp.ne.s32.totalorder %s2064_s2, %s1399_s29  ;;  %p1406_p11 = scmp.lt.u32.totalorder %s1399_s29, %s2064_s2 }
  0x2b   : > { %p1402_p9 = pnand %p1401_p8, %p1400_p6 }
  0x2d   : > { %p1403_p10 = pneg %p1402_p9 }
  0x2f   : > { %p1408_p13 = pnand %p1406_p11, %p1403_p10 }
  0x31   : > { %1411 = shalt.err (!%p1408_p13)
}
  0x32   : > { %s1412_s24 = scalar_lea.vmem %s150_s23, 2048  ;;  %p1420_p7 = scmp.lt.s32.totalorder %s150_s23, %s150_s23 }
  0x33   : > { %p1413_p0 = scmp.ne.s32.totalorder %s150_s23, %s1412_s24  ;;  %p1421_p1 = scmp.lt.s32.totalorder %s1412_s24, %s1412_s24 }
  0x35   : > { %p1415_p4 = pnand %p1413_p0, %p1401_p8  ;;  %p1422_p2 = por %p1421_p1, %p1420_p7 }
  0x37   : > { %p1416_p12 = pneg %p1415_p4 }
  0x39   : > { %p1423_p3 = pnand %p1422_p2, %p1416_p12 }
  0x3b   : > { %1426 = shalt.err (!%p1423_p3)
}
  0x3c   : > { %s1672_s22 = smov 128   ;;  %s1673_s27 = smov 8  }
  0x3d   : > { %1170 = dma.hbm_to_vmem [thread:$0]  (!%p1805_p5), %s2064_s2, 2048, %s150_s23, [#allocation6], %s1672_s22, %s1672_s22, %s1673_s27  }
  0x3e   : > { %p1035_p6 = scmp.ge.s32.totalorder %s1605_s21, 4 }
  0x3f   : > { %p2065_p9 = scmp.ne.s32.totalorder (!%p1035_p6), %s2055_s28, 0 }
  0x40   : > { %159 = sbr.rel (%p1035_p6) target bundleno = 199 (0xc7), region = 20 }
  0x47   : > { %162 = sbr.rel (!%p2065_p9) target bundleno = 134 (0x86), region = 24  ;;  %s164_s24 = sand.u32 (%p2065_p9), 1, %s1585_s16  }
  0x48   : > { %s1037_s25 = sshll.u32 (%p2065_p9), %s1601_s20, 3  ;;  %s1036_s29 = sshll.u32 (%p2065_p9), %s164_s24, 5 }
  0x49   : > { %s168_s11 = ssub.s32 (%p2065_p9), 12, %s1037_s25  ;;  %s1079_s26 = sshll.u32 (%p2065_p9), %s1601_s20, 4 }
  0x4a   : > { %p169_p3 = scmp.lt.s32.totalorder (%p2065_p9), %s168_s11, 8  ;;  %s174_s23 = sadd.s32 (%p2065_p9), %s1597_s19, %s1079_s26 }
  0x4b   : > { %s1041_s27 = sshll.u32 (%p2065_p9), %s174_s23, 2  ;;  %s2066_s0 = sld [smem:[#allocation16_spill]] (%p2065_p9) }
  0x4c   : > { %s1840_s8 = scalar_lea.vmem (%p2065_p9), [#allocation3], %s1036_s29  }
  0x4e   : > { %s2098_s11 = smov (!%p169_p3, %s168_s11), 8 }
  0x4f   : > { %s1038_s22 = sshll.u32 %s2098_s11, 6 }
  0x50   : > { %p1042_p7 = scmp.eq.s32.totalorder %s1038_s22, 0 }
  0x51   : > { %s1838_s2 = scalar_lea.vmem %s2066_s0, %s1041_s27   ;;  %s1843_s24 = sshrl.u32 (!%p1042_p7), %s2098_s11, 3 }
  0x52   : > { %179 = sbr.rel (%p1042_p7) target bundleno = 134 (0x86), region = 28  ;;  %p1043_p12 = scmp.le.s32.totalorder (!%p1042_p7), %s1843_s24, 0 }
  0x59   : > { %933 = sbr.rel (%p1043_p12) target bundleno = 113 (0x71), region = 199  ;;  %s2067_s25 = smov (!%p1043_p12), %s1840_s8 }
  0x5a   : > { %s2068_s26 = smov (!%p1043_p12), %s1838_s2  ;;  %s1852_s23 = smov (!%p1043_p12), 0  }
  0x5b   : > { %s1854_s27 = smov (!%p1043_p12), 0  }
  0x60 LB: >> { %v195_v0 = vld [vmem:[%s1613_s26] sm:$0xf]  ;;  %v197_v1 = vld [vmem:[%s1613_s26 + $0x8] sm:$0xf]  ;;  %v199_v2 = vld [vmem:[%s1613_s26 + $0x10] sm:$0xf]  ;;  %s1621_s27 = sphi %s1854_s27, %s189_s27   ;;  %s1617_s23 = sphi %s1852_s23, %s2069_s23   ;;  %s1613_s26 = sphi %s2068_s26, %s216_s26   ;;  %s1609_s25 = sphi %s2067_s25, %s217_s25  }
  0x61   : >> { %196 = vst [vmem:[%s1609_s25] sm:$0xf] %v195_v0  ;;  %198 = vst [vmem:[%s1609_s25 + $0x4] sm:$0xf] %v197_v1  ;;  %v201_v3 = vld [vmem:[%s1613_s26 + $0x18] sm:$0xf]  ;;  %s211_s29 = sadd.s32 1, %s1617_s23 }
  0x62   : >> { %200 = vst [vmem:[%s1609_s25 + $0x8] sm:$0xf] %v199_v2  ;;  %v203_v4 = vld [vmem:[%s1613_s26 + $0x20] sm:$0xf]  ;;  %v205_v5 = vld [vmem:[%s1613_s26 + $0x28] sm:$0xf]  ;;  %p212_p1 = scmp.ge.s32.totalorder %s211_s29, %s1843_s24 }
  0x63   : >> { %202 = vst [vmem:[%s1609_s25 + $0xc] sm:$0xf] %v201_v3  ;;  %204 = vst [vmem:[%s1609_s25 + $0x10] sm:$0xf] %v203_v4  ;;  %v207_v6 = vld [vmem:[%s1613_s26 + $0x30] sm:$0xf] }
  0x64   : >> { %206 = vst [vmem:[%s1609_s25 + $0x14] sm:$0xf] %v205_v5  ;;  %v209_v7 = vld [vmem:[%s1613_s26 + $0x38] sm:$0xf]  ;;  %208 = vst [vmem:[%s1609_s25 + $0x18] sm:$0xf] %v207_v6 }
  0x65   : >> { %210 = vst [vmem:[%s1609_s25 + $0x1c] sm:$0xf] %v209_v7  ;;  %s2100_s29 = smov (%p212_p1, %s211_s29), 0  ;;  %s189_s27 = sadd.s32 1, %s1621_s27  }
  0x66   : >> { %s1044_s22 = sshll.u32 %s2100_s29, 6  ;;  %s1045_s4 = sshll.u32 %s2100_s29, 5 }
  0x67   : >> { %s216_s26 = scalar_lea.vmem %s1838_s2, %s1044_s22   ;;  %s217_s25 = scalar_lea.vmem %s1840_s8, %s1045_s4 [#allocation3]  }
  0x68   : >> { %p188_p2 = scmp.ge.s32.totalorder %s189_s27, %s1843_s24  ;;  %s2069_s23 = smov %s2100_s29 }
  0x6a   : > { %191 = sbr.rel (!%p188_p2) target bundleno = 96 (0x60), region = 205 }
  0x71 PF: > { %s1876_s5 = sand.u32 7, %s2098_s11   ;;  %s1080_s22 = sshll.u32 %s1843_s24, 6 }
  0x72   : > { %s1880_s4 = scalar_lea.vmem %s1838_s2, %s1080_s22   ;;  %s1081_s0 = sshll.u32 %s1843_s24, 5 }
  0x73   : > { %s224_s7 = scalar_lea.vmem %s1840_s8, %s1081_s0 [#allocation3]   ;;  %p1049_p5 = scmp.le.s32.totalorder %s1876_s5, 0 }
  0x74   : > { %s1623_s29 = smov (!%p1049_p5), %s224_s7   ;;  %s1627_s27 = smov (!%p1049_p5), %s1880_s4  }
  0x75   : > { %947 = sbr.rel (%p1049_p5) target bundleno = 134 (0x86), region = 210  ;;  %s1631_s14 = smov (!%p1049_p5), 0  }
  0x76   : > { %s1635_s25 = smov (!%p1049_p5), 0  }
  0x7c LB: >> { %v234_v8 = vld [vmem:[%s1629_s27] sm:$0xf]  ;;  %s236_s2 = sadd.s32 1, %s1633_s14  ;;  %s228_s25 = sadd.s32 1, %s1637_s25   ;;  %s1637_s25 = sphi %s1635_s25, %s228_s25   ;;  %s1633_s14 = sphi %s1631_s14, %s1632_s14   ;;  %s1629_s27 = sphi %s1627_s27, %s241_s27   ;;  %s1625_s29 = sphi %s1623_s29, %s242_s29  }
  0x7d   : >> { %235 = vst [vmem:[%s1625_s29] sm:$0xf] %v234_v8  ;;  %p237_p8 = scmp.ge.s32.totalorder %s236_s2, %s1876_s5  ;;  %p227_p10 = scmp.ge.s32.totalorder %s228_s25, %s1876_s5 }
  0x7f   : >> { %s2102_s2 = smov (%p237_p8, %s236_s2), 0  ;;  %230 = sbr.rel (!%p227_p10) target bundleno = 124 (0x7c), region = 216 }
  0x80   : >> { %s1050_s0 = sshll.u32 %s2102_s2, 3  ;;  %s1051_s8 = sshll.u32 %s2102_s2, 2 }
  0x81   : >> { %s241_s27 = scalar_lea.vmem %s1880_s4, %s1050_s0   ;;  %s242_s29 = scalar_lea.vmem %s224_s7, %s1051_s8 [#allocation3]  }
  0x82   : >> { %s1632_s14 = smov %s2102_s2  }
  0x86 PF: > { %p2070_p11 = scmp.ne.s32.totalorder %s2055_s28, 0 }
  0x87   : > { %s309_s14 = sand.u32 (%p2070_p11), 1, %s1585_s16   ;;  %s1053_s11 = sshll.u32 (%p2070_p11), %s1601_s20, 3 }
  0x88   : > { %307 = sbr.rel (!%p2070_p11) target bundleno = 199 (0xc7), region = 72  ;;  %s1052_s24 = sshll.u32 (%p2070_p11), %s309_s14, 5 }
  0x89   : > { %s313_s26 = ssub.s32 (%p2070_p11), 12, %s1053_s11  ;;  %s1082_s23 = sshll.u32 (%p2070_p11), %s1601_s20, 4 }
  0x8a   : > { %p314_p13 = scmp.lt.s32.totalorder (%p2070_p11), %s313_s26, 8  ;;  %s319_s22 = sadd.s32 (%p2070_p11), %s1597_s19, %s1082_s23 }
  0x8b   : > { %s1057_s5 = sshll.u32 (%p2070_p11), %s319_s22, 2  ;;  %s1903_s27 = scalar_lea.vmem (%p2070_p11), [#allocation4], %s1052_s24  }
  0x8c   : > { %s1901_s28 = scalar_lea.vmem (%p2070_p11), %s2041_s1, %s1057_s5  }
  0x8f   : > { %s2104_s26 = smov (!%p314_p13, %s313_s26), 8 }
  0x90   : > { %s1054_s7 = sshll.u32 %s2104_s26, 6 }
  0x91   : > { %p1058_p0 = scmp.eq.s32.totalorder %s1054_s7, 0 }
  0x92   : > { %s1906_s25 = sshrl.u32 (!%p1058_p0), %s2104_s26, 3 }
  0x93   : > { %324 = sbr.rel (%p1058_p0) target bundleno = 199 (0xc7), region = 76  ;;  %p1059_p4 = scmp.le.s32.totalorder (!%p1058_p0), %s1906_s25, 0 }
  0x9a   : > { %961 = sbr.rel (%p1059_p4) target bundleno = 178 (0xb2), region = 221  ;;  %s2071_s2 = smov (!%p1059_p4), %s1903_s27 }
  0x9b   : > { %s2072_s0 = smov (!%p1059_p4), %s1901_s28  ;;  %s1915_s8 = smov (!%p1059_p4), 0  }
  0x9c   : > { %s1917_s14 = smov (!%p1059_p4), 0  }
  0xa1 LB: >> { %v340_v9 = vld [vmem:[%s1645_s0] sm:$0xf]  ;;  %v342_v10 = vld [vmem:[%s1645_s0 + $0x8] sm:$0xf]  ;;  %v344_v11 = vld [vmem:[%s1645_s0 + $0x10] sm:$0xf]  ;;  %s1653_s14 = sphi %s1917_s14, %s334_s14   ;;  %s1649_s8 = sphi %s1915_s8, %s2073_s8   ;;  %s1645_s0 = sphi %s2072_s0, %s361_s0   ;;  %s1641_s2 = sphi %s2071_s2, %s362_s2  }
  0xa2   : >> { %341 = vst [vmem:[%s1641_s2] sm:$0xf] %v340_v9  ;;  %343 = vst [vmem:[%s1641_s2 + $0x4] sm:$0xf] %v342_v10  ;;  %v346_v12 = vld [vmem:[%s1645_s0 + $0x18] sm:$0xf]  ;;  %s356_s11 = sadd.s32 1, %s1649_s8 }
  0xa3   : >> { %345 = vst [vmem:[%s1641_s2 + $0x8] sm:$0xf] %v344_v11  ;;  %v348_v13 = vld [vmem:[%s1645_s0 + $0x20] sm:$0xf]  ;;  %v350_v14 = vld [vmem:[%s1645_s0 + $0x28] sm:$0xf]  ;;  %p357_p6 = scmp.ge.s32.totalorder %s356_s11, %s1906_s25 }
  0xa4   : >> { %347 = vst [vmem:[%s1641_s2 + $0xc] sm:$0xf] %v346_v12  ;;  %349 = vst [vmem:[%s1641_s2 + $0x10] sm:$0xf] %v348_v13  ;;  %v352_v15 = vld [vmem:[%s1645_s0 + $0x30] sm:$0xf] }
  0xa5   : >> { %351 = vst [vmem:[%s1641_s2 + $0x14] sm:$0xf] %v350_v14  ;;  %v354_v16 = vld [vmem:[%s1645_s0 + $0x38] sm:$0xf]  ;;  %353 = vst [vmem:[%s1641_s2 + $0x18] sm:$0xf] %v352_v15 }
  0xa6   : >> { %355 = vst [vmem:[%s1641_s2 + $0x1c] sm:$0xf] %v354_v16  ;;  %s2106_s11 = smov (%p357_p6, %s356_s11), 0  ;;  %s334_s14 = sadd.s32 1, %s1653_s14  }
  0xa7   : >> { %s1060_s24 = sshll.u32 %s2106_s11, 6  ;;  %s1061_s23 = sshll.u32 %s2106_s11, 5 }
  0xa8   : >> { %s361_s0 = scalar_lea.vmem %s1901_s28, %s1060_s24   ;;  %s362_s2 = scalar_lea.vmem %s1903_s27, %s1061_s23 [#allocation4]  }
  0xa9   : >> { %p333_p9 = scmp.ge.s32.totalorder %s334_s14, %s1906_s25  ;;  %s2073_s8 = smov %s2106_s11 }
  0xab   : > { %336 = sbr.rel (!%p333_p9) target bundleno = 161 (0xa1), region = 227 }
  0xb2 PF: > { %s1939_s22 = sand.u32 7, %s2104_s26   ;;  %s1083_s7 = sshll.u32 %s1906_s25, 6 }
  0xb3   : > { %s1943_s5 = scalar_lea.vmem %s1901_s28, %s1083_s7   ;;  %s1084_s4 = sshll.u32 %s1906_s25, 5 }
  0xb4   : > { %s369_s29 = scalar_lea.vmem %s1903_s27, %s1084_s4 [#allocation4]   ;;  %p1065_p3 = scmp.le.s32.totalorder %s1939_s22, 0 }
  0xb5   : > { %s1655_s11 = smov (!%p1065_p3), %s369_s29   ;;  %s1659_s14 = smov (!%p1065_p3), %s1943_s5  }
  0xb6   : > { %975 = sbr.rel (%p1065_p3) target bundleno = 199 (0xc7), region = 232  ;;  %s1663_s24 = smov (!%p1065_p3), 0  }
  0xb7   : > { %s1667_s2 = smov (!%p1065_p3), 0  }
  0xbd LB: >> { %v379_v17 = vld [vmem:[%s1661_s14] sm:$0xf]  ;;  %s381_s26 = sadd.s32 1, %s1665_s24  ;;  %s373_s2 = sadd.s32 1, %s1669_s2   ;;  %s1669_s2 = sphi %s1667_s2, %s373_s2   ;;  %s1665_s24 = sphi %s1663_s24, %s1664_s24   ;;  %s1661_s14 = sphi %s1659_s14, %s386_s14   ;;  %s1657_s11 = sphi %s1655_s11, %s387_s11  }
  0xbe   : >> { %380 = vst [vmem:[%s1657_s11] sm:$0xf] %v379_v17  ;;  %p382_p7 = scmp.ge.s32.totalorder %s381_s26, %s1939_s22  ;;  %p372_p12 = scmp.ge.s32.totalorder %s373_s2, %s1939_s22 }
  0xc0   : >> { %s2108_s26 = smov (%p382_p7, %s381_s26), 0  ;;  %375 = sbr.rel (!%p372_p12) target bundleno = 189 (0xbd), region = 238 }
  0xc1   : >> { %s1066_s28 = sshll.u32 %s2108_s26, 3  ;;  %s1067_s27 = sshll.u32 %s2108_s26, 2 }
  0xc2   : >> { %s386_s14 = scalar_lea.vmem %s1943_s5, %s1066_s28   ;;  %s387_s11 = scalar_lea.vmem %s369_s29, %s1067_s27 [#allocation4]  }
  0xc3   : >> { %s1664_s24 = smov %s2108_s26  }
  0xc7 PF: > { %p2074_p1 = scmp.ne.s32.totalorder %s2062_s10, 0 }
  0xc8   : > { %s458_s25 = sand.u32 (!%p2074_p1), 1, %s1581_s15   ;;  %p2075_p2 = scmp.ne.s32.totalorder (!%p2074_p1), %s2061_s9, 0 }
  0xc9   : > { %455 = sbr.rel (%p2074_p1) target bundleno = 796 (0x31c), region = 120  ;;  %s1069_s0 = sshll.u32 (!%p2074_p1), %s458_s25, 5 }
  0xca   : > { %s1955_s8 = scalar_lea.vmem (!%p2074_p1), [#allocation3], %s1069_s0  ;;  %s467_s23 = scalar_lea.vmem (!%p2074_p1), [#allocation4], %s1069_s0 }
  0xd0   : > { %1560 = dma.done.wait (%p2075_p2), [#allocation6], 2048  }
  0xd1   : > { %1562 = vsyncadd (%p2075_p2), [#allocation6], 4294965248  ;;  %s493_s22 = sand.u32 1, %s1573_s13   ;;  %p1073_p5 = scmp.ne.s32.totalorder %s1589_s17, 0 }
  0xd2   : > { %s1964_s7 = sshll.u32 %s493_s22, 3  ;;  %v1674_v18 = vmov (!%p1073_p5), 0.0  }
  0xd3   : > { %s495_s10 = scalar_lea.vmem [#allocation8], %s1964_s7  ;;  %509 = sbr.rel (%p1073_p5) target bundleno = 218 (0xda), region = 136  ;;  %510 = vst [vmem:[#allocation2] sm:$0xff] (!%p1073_p5), %v1674_v18 }
  0xda PF: > { %v521_v19 = vld [vmem:[%s467_s23 + $0x8] sm:$0xf]  ;;  %v519_v20 = vld [vmem:[%s467_s23] sm:$0xf]  ;;  %v1675_v21 = vmov 0   ;;  %v535_v30 = vlaneseq  ;;  %vm696_vm0 = vcmask 1041409  }
  0xdb   : > { %1396 = vset.pattern.permute.xlu1 %v1675_v21  ;;  %1395 = vset.pattern.permute.xlu0 %v1675_v21  ;;  %v522_v22 = vld [vmem:[%s467_s23 + $0xc] sm:$0xf]  ;;  %v520_v23 = vld [vmem:[%s467_s23 + $0x4] sm:$0xf]  ;;  %v524_v24 = vld [vmem:[%s467_s23 + $0x14] sm:$0xf] }
  0xdc   : > { %553 = vperm.xlu1 %1396, %v521_v19   ;;  %529 = vperm.xlu0 %1395, %v519_v20   ;;  %v523_v25 = vld [vmem:[%s467_s23 + $0x10] sm:$0xf]  ;;  %v526_v26 = vld [vmem:[%s467_s23 + $0x1c] sm:$0xf]  ;;  %v525_v27 = vld [vmem:[%s467_s23 + $0x18] sm:$0xf] }
  0xdd   : > { %v1676_v28 = vmov 839922192   ;;  %v536_v32 = vshrl.u32 %v535_v30, 7  ;;  %v513_v35 = vld [vmem:[%s1955_s8 + $0x8] sm:$0xf]  ;;  %vm698_vm1 = vcmask 1042434  }
  0xde   : > { %v533_v29 = vunpack.c.l.s4 %v1676_v28  ;;  %v511_v37 = vld [vmem:[%s1955_s8] sm:$0xf]  ;;  %v514_v43 = vld [vmem:[%s1955_s8 + $0xc] sm:$0xf]  ;;  %v512_v45 = vld [vmem:[%s1955_s8 + $0x4] sm:$0xf] }
  0xdf   : > { %v516_v60 = vld [vmem:[%s1955_s8 + $0x14] sm:$0xf]  ;;  %v515_v61 = vld [vmem:[%s1955_s8 + $0x10] sm:$0xf]  ;;  %v518_v12 = vld [vmem:[%s1955_s8 + $0x1c] sm:$0xf] }
  0xe0   : > { %565 = vperm.xlu1 %1396, %v522_v22   ;;  %541 = vperm.xlu0 %1395, %v520_v23   ;;  %v534_v31 = vunpack.c.0.s8 %v533_v29  ;;  %v517_v13 = vld [vmem:[%s1955_s8 + $0x18] sm:$0xf]  ;;  %vm700_vm2 = vcmask 1043459   ;;  %vm702_vm3 = vcmask 1044484   ;;  %vm704_vm4 = vcmask 1045509   ;;  %p1074_p8 = scmp.ne.s32.totalorder %s1589_s17, 1 }
  0xe1   : > { %vm706_vm5 = vcmask 1046534   ;;  %vm708_vm6 = vcmask 1047559   ;;  %vm1678_vm7 = vmmov (!%p1074_p8), 0  }
  0xe2   : > { %v537_v33 = vsub.s32 %v534_v31, %v536_v32 }
  0xe4   : > { %589 = vperm.xlu1 %1396, %v524_v24   ;;  %577 = vperm.xlu0 %1395, %v523_v25  }
  0xe8   : > { %613 = vperm.xlu1 %1396, %v526_v26   ;;  %601 = vperm.xlu0 %1395, %v525_v27  }
 0x15b   : > { %v554_v34 = vpop.permute.xlu1 %553  ;;  %v530_v36 = vpop.permute.xlu0 %529 }
 0x15c   : > { %v562_v38 = vrot.slane %v554_v34, %v537_v33  ;;  %v538_v39 = vrot.slane %v530_v36, %v537_v33 }
 0x15e   : > { %v625_v40 = vmul.bf16 %v562_v38, %v513_v35  ;;  %v623_v41 = vmul.bf16 %v538_v39, %v511_v37 }
 0x15f   : > { %v566_v42 = vpop.permute.xlu1 %565  ;;  %v542_v44 = vpop.permute.xlu0 %541 }
 0x160   : > { %v634_v46 = vunpack.c.l.bf16 %v625_v40  ;;  %v632_v47 = vunpack.c.l.bf16 %v623_v41  ;;  %v574_v48 = vrot.slane %v566_v42, %v537_v33  ;;  %v550_v49 = vrot.slane %v542_v44, %v537_v33 }
 0x162   : > { %v652_v50 = vrot.slane %v634_v46, 4  ;;  %v640_v51 = vrot.slane %v632_v47, 4  ;;  %v626_v52 = vmul.bf16 %v574_v48, %v514_v43  ;;  %v624_v53 = vmul.bf16 %v550_v49, %v512_v45 }
 0x163   : > { %v590_v54 = vpop.permute.xlu1 %589  ;;  %v578_v55 = vpop.permute.xlu0 %577 }
 0x164   : > { %v653_v56 = vadd.f32 %v652_v50, %v634_v46  ;;  %v641_v57 = vadd.f32 %v640_v51, %v632_v47  ;;  %v635_v58 = vunpack.c.l.bf16 %v626_v52  ;;  %v633_v59 = vunpack.c.l.bf16 %v624_v53 }
 0x165   : > { %v598_v62 = vrot.slane %v590_v54, %v537_v33  ;;  %v586_v63 = vrot.slane %v578_v55, %v537_v33 }
 0x166   : > { %v654_v0 = vrot.slane %v653_v56, 2  ;;  %v642_v1 = vrot.slane %v641_v57, 2  ;;  %v658_v2 = vrot.slane %v635_v58, 4  ;;  %v646_v3 = vrot.slane %v633_v59, 4 }
 0x167   : > { %v628_v4 = vmul.bf16 %v598_v62, %v516_v60  ;;  %v627_v5 = vmul.bf16 %v586_v63, %v515_v61  ;;  %v614_v6 = vpop.permute.xlu1 %613  ;;  %v602_v7 = vpop.permute.xlu0 %601  ;;  %v631_v62 = vld [vmem:[#allocation2] sm:$0xff] }
 0x168   : > { %v655_v8 = vadd.f32 %v654_v0, %v653_v56  ;;  %v643_v9 = vadd.f32 %v642_v1, %v641_v57  ;;  %v659_v10 = vadd.f32 %v658_v2, %v635_v58  ;;  %v647_v11 = vadd.f32 %v646_v3, %v633_v59  ;;  %v718_v3 = vld [vmem:[#allocation5] sm:$0xff] (!%p1074_p8) }
 0x169   : > { %v637_v14 = vunpack.c.l.bf16 %v628_v4  ;;  %v636_v15 = vunpack.c.l.bf16 %v627_v5  ;;  %v622_v16 = vrot.slane %v614_v6, %v537_v33  ;;  %v610_v17 = vrot.slane %v602_v7, %v537_v33  ;;  %v719_v4 = vld [vmem:[#allocation5 + $0x8] sm:$0xff] (!%p1074_p8)  ;;  %v720_v5 = vld [vmem:[#allocation5 + $0x10] sm:$0xff] (!%p1074_p8) }
 0x16a   : > { %v660_v18 = vrot.slane %v659_v10, 2  ;;  %v648_v19 = vrot.slane %v647_v11, 2  ;;  %v656_v24 = vrot.slane %v655_v8, 1  ;;  %v644_v25 = vrot.slane %v643_v9, 1 }
 0x16b   : > { %v670_v20 = vrot.slane %v637_v14, 4  ;;  %v664_v21 = vrot.slane %v636_v15, 4  ;;  %v630_v22 = vmul.bf16 %v622_v16, %v518_v12  ;;  %v629_v23 = vmul.bf16 %v610_v17, %v517_v13  ;;  %v723_v12 = vld [vmem:[#allocation5 + $0x28] sm:$0xff] (!%p1074_p8)  ;;  %v726_v17 = vld [vmem:[#allocation5 + $0x40] sm:$0xff] (!%p1074_p8) }
 0x16c   : > { %v661_v26 = vadd.f32 %v660_v18, %v659_v10  ;;  %v649_v27 = vadd.f32 %v648_v19, %v647_v11  ;;  %v657_v38 = vadd.f32 %v656_v24, %v655_v8  ;;  %v645_v39 = vadd.f32 %v644_v25, %v643_v9  ;;  %v721_v8 = vld [vmem:[#allocation5 + $0x18] sm:$0xff] (!%p1074_p8)  ;;  %v722_v11 = vld [vmem:[#allocation5 + $0x20] sm:$0xff] (!%p1074_p8)  ;;  %v727_v18 = vld [vmem:[#allocation5 + $0x48] sm:$0xff] (!%p1074_p8) }
 0x16d   : > { %v671_v28 = vadd.f32 %v670_v20, %v637_v14  ;;  %v665_v29 = vadd.f32 %v664_v21, %v636_v15  ;;  %v639_v30 = vunpack.c.l.bf16 %v630_v22  ;;  %v638_v31 = vunpack.c.l.bf16 %v629_v23  ;;  %v724_v14 = vld [vmem:[#allocation5 + $0x30] sm:$0xff] (!%p1074_p8)  ;;  %v725_v15 = vld [vmem:[#allocation5 + $0x38] sm:$0xff] (!%p1074_p8)  ;;  %v730_v23 = vld [vmem:[#allocation5 + $0x60] sm:$0xff] (!%p1074_p8) }
 0x16e   : > { %v662_v32 = vrot.slane %v661_v26, 1  ;;  %v650_v34 = vrot.slane %v649_v27, 1  ;;  %v1677_v6 = vmov (!%p1074_p8), 0.0|0.0   ;;  %v1138_v7 = vpack.c.bf16 (!%p1074_p8), %v719_v4, %v718_v3  ;;  %v728_v20 = vld [vmem:[#allocation5 + $0x50] sm:$0xff] (!%p1074_p8)  ;;  %v729_v21 = vld [vmem:[#allocation5 + $0x58] sm:$0xff] (!%p1074_p8)  ;;  %v731_v24 = vld [vmem:[#allocation5 + $0x68] sm:$0xff] (!%p1074_p8) }
 0x16f   : > { %v672_v35 = vrot.slane %v671_v28, 2  ;;  %v666_v36 = vrot.slane %v665_v29, 2  ;;  %v682_v33 = vrot.slane %v639_v30, 4  ;;  %v676_v37 = vrot.slane %v638_v31, 4  ;;  %1137 = vmatprep.subr.bf16.mxu0 (!%p1074_p8), %v1677_v6 }
 0x170   : > { %v651_v40 = vadd.f32 %v650_v34, %v649_v27  ;;  %v663_v45 = vadd.f32 %v662_v32, %v661_v26  ;;  %v1679_v9 = vmov (!%p1074_p8), 0.0   ;;  %1139 = vmatpush3.bf16.msra.mxu0 (!%p1074_p8), %v1138_v7  ;;  %v1141_v10 = vpack.c.bf16 (!%p1074_p8), %v721_v8, %v720_v5  ;;  %v732_v26 = vld [vmem:[#allocation5 + $0x70] sm:$0xff] (!%p1074_p8)  ;;  %v733_v27 = vld [vmem:[#allocation5 + $0x78] sm:$0xff] (!%p1074_p8) }
 0x171   : > { %v673_v41 = vadd.f32 %v672_v35, %v671_v28  ;;  %v667_v42 = vadd.f32 %v666_v36, %v665_v29  ;;  %v683_v43 = vadd.f32 %v682_v33, %v639_v30  ;;  %v677_v44 = vadd.f32 %v676_v37, %v638_v31  ;;  %1134 = vmatprep.mubr.msk.f32.mxu0 (!%p1074_p8), %vm1678_vm7, %v1679_v9 }
 0x172   : > { %v697_v46 = vsel %vm696_vm0, %v651_v40, %v645_v39  ;;  %1140 = vmatprep.subr.bf16.mxu0 (!%p1074_p8), %v1677_v6  ;;  %v1144_v13 = vpack.c.bf16 (!%p1074_p8), %v723_v12, %v722_v11  ;;  %v1147_v16 = vpack.c.bf16 (!%p1074_p8), %v725_v15, %v724_v14  ;;  %v1150_v19 = vpack.c.bf16 (!%p1074_p8), %v727_v18, %v726_v17 }
 0x173   : > { %v699_v47 = vsel %vm698_vm1, %v657_v38, %v697_v46  ;;  %v674_v48 = vrot.slane %v673_v41, 1  ;;  %v668_v49 = vrot.slane %v667_v42, 1  ;;  %v684_v50 = vrot.slane %v683_v43, 2 }
 0x174   : > { %v678_v51 = vrot.slane %v677_v44, 2  ;;  %v701_v53 = vsel %vm700_vm2, %v663_v45, %v699_v47  ;;  %1142 = vmatpush3.bf16.msra.mxu0 (!%p1074_p8), %v1141_v10  ;;  %v1153_v22 = vpack.c.bf16 (!%p1074_p8), %v729_v21, %v728_v20  ;;  %v1156_v25 = vpack.c.bf16 (!%p1074_p8), %v731_v24, %v730_v23 }
 0x175   : > { %v669_v52 = vadd.f32 %v668_v49, %v667_v42  ;;  %v685_v54 = vadd.f32 %v684_v50, %v683_v43  ;;  %v675_v56 = vadd.f32 %v674_v48, %v673_v41  ;;  %1143 = vmatprep.subr.bf16.mxu0 (!%p1074_p8), %v1677_v6  ;;  %v1159_v28 = vpack.c.bf16 (!%p1074_p8), %v733_v27, %v732_v26 }
 0x176   : > { %v679_v55 = vadd.f32 %v678_v51, %v677_v44 }
 0x177   : > { %v686_v57 = vrot.slane %v685_v54, 1  ;;  %v703_v58 = vsel %vm702_vm3, %v669_v52, %v701_v53 }
 0x178   : > { %v680_v59 = vrot.slane %v679_v55, 1  ;;  %v705_v63 = vsel %vm704_vm4, %v675_v56, %v703_v58  ;;  %1145 = vmatpush3.bf16.msra.mxu0 (!%p1074_p8), %v1144_v13 }
 0x179   : > { %v687_v60 = vadd.f32 %v686_v57, %v685_v54  ;;  %1146 = vmatprep.subr.bf16.mxu0 (!%p1074_p8), %v1677_v6 }
 0x17a   : > { %v681_v61 = vadd.f32 %v680_v59, %v679_v55  ;;  %716 = sbr.rel (%p1074_p8) target bundleno = 771 (0x303), region = 140 }
 0x17c   : > { %v707_v0 = vsel %vm706_vm5, %v681_v61, %v705_v63  ;;  %1148 = vmatpush3.bf16.msra.mxu0 (!%p1074_p8), %v1147_v16 }
 0x17d   : > { %v709_v1 = vsel %vm708_vm6, %v687_v60, %v707_v0  ;;  %1149 = vmatprep.subr.bf16.mxu0 (!%p1074_p8), %v1677_v6 }
 0x17e   : > { %v711_v2 = vadd.f32 %v709_v1, %v631_v62 }
 0x180   : > { %712 = vst [vmem:[#allocation2] sm:$0xff] %v711_v2  ;;  %1151 = vmatpush3.bf16.msra.mxu0 (!%p1074_p8), %v1150_v19 }
 0x181   : > { %1152 = vmatprep.subr.bf16.mxu0 %v1677_v6 }
 0x184   : > { %1154 = vmatpush3.bf16.msra.mxu0 %v1153_v22 }
 0x185   : > { %1155 = vmatprep.subr.bf16.mxu0 %v1677_v6 }
 0x187   : > { %v717_v29 = vld [vmem:[#allocation2] sm:$0xff] }
 0x188   : > { %1157 = vmatpush3.bf16.msra.mxu0 %v1156_v25 }
 0x189   : > { %1158 = vmatprep.subr.bf16.mxu0 %v1677_v6 }
 0x18c   : > { %1160 = vmatpush3.bf16.msra.mxu0 %v1159_v28 }
 0x18f   : > { %1135 = vmatmul.mubr.f32.vlgmr.msra.gmra.mrb[0].mxu0 %v717_v29 }
 0x262   : > { %v800_v30 = vpop.f32.mrb[0].mxu0 }
 0x263   : > { %v1136_v31 = vpop.f32.mrb[1].mxu0  ;;  %v804_v32 = vmul.f32 %v800_v30, %v800_v30 }
 0x265   : > { %805 = vadd.xlane.f32.xlu0 %v804_v32 }
 0x2f2   : > { %v806_v34 = vpop.xlane.xlu0 %805 }
 0x2f3   : > { %v807_v35 = vmax.f32 %v806_v34, 1e-12 }
 0x2f5   : > { %1397 = vrsqrt.f32 %v807_v35 }
 0x2ff   : > { %v1398_v36 = vpop.eup %1397 }
 0x300   : > { %v809_v33 = vmul.f32 %v1398_v36, %v800_v30 }
 0x302   : > { %810 = vst [vmem:[%s495_s10] sm:$0xff] %v809_v33 }
 0x303 PF: > { %s1076_s15 = sshll.u32 %s1593_s18, 7  ;;  %s825_s4 = sshll.u32 %s495_s10, 4  ;;  %s826_s4 = int_to_ptr.vmem [resolvable:$true] %s825_s4 }
 0x304   : > { %s1983_s5 = scalar_lea.hbm %s2043_s3, %s1076_s15  ;;  %s812_s29 = scalar_lea.sflag [#allocation7], %s493_s22 }
 0x305   : > { %s1427_s11 = scalar_lea.vmem %s826_s4, 128  ;;  %p2076_p11 = scmp.ne.s32.totalorder %s2057_s30, 0 }
 0x306   : > { %p1428_p10 = scmp.ne.s32.totalorder %s826_s4, %s1427_s11  ;;  %s1680_s14 = smov [#allocation8]  }
 0x307   : > { %s1431_s24 = sshll.u32 %s1680_s14, 4  ;;  %s1432_s24 = int_to_ptr.vmem [resolvable:$false] %s1431_s24 }
 0x308   : > { %p1429_p13 = pnand %p1428_p10, %p2076_p11  ;;  %s1433_s2 = scalar_lea.vmem %s1432_s24, 256 }
 0x309   : > { %p1434_p4 = scmp.lt.s32.totalorder %s826_s4, %s1432_s24  ;;  %p1435_p6 = scmp.lt.s32.totalorder %s1433_s2, %s1427_s11 }
 0x30a   : > { %p1430_p0 = pneg %p1429_p13 }
 0x30b   : > { %p1436_p9 = por %p1435_p6, %p1434_p4 }
 0x30d   : > { %p1437_p3 = pnand %p1436_p9, %p1430_p0 }
 0x30f   : > { %1440 = shalt.err (!%p1437_p3)
}
 0x310   : > { %s1441_s18 = scalar_lea.hbm %s1983_s5, 128  ;;  %s1445_s27 = scalar_lea.hbm %s2043_s3, 256 }
 0x311   : > { %p1442_p7 = scmp.ne.s32.totalorder %s1983_s5, %s1441_s18  ;;  %p1446_p2 = scmp.lt.u32.totalorder %s1983_s5, %s2043_s3 }
 0x312   : > { %p1447_p5 = scmp.lt.u32.totalorder %s1445_s27, %s1441_s18  ;;  %p1449_p10 = scmp.lt.u32.totalorder %s1441_s18, %s1983_s5 }
 0x313   : > { %p1443_p12 = pnand %p1442_p7, %p2076_p11 }
 0x314   : > { %p1448_p8 = por %p1447_p5, %p1446_p2 }
 0x315   : > { %p1444_p1 = pneg %p1443_p12 }
 0x316   : > { %p1450_p13 = por %p1449_p10, %p1448_p8 }
 0x318   : > { %p1451_p0 = pnand %p1450_p13, %p1444_p1 }
 0x31a   : > { %1454 = shalt.err (!%p1451_p0)
}
 0x31b   : > { %1165 = dma.vmem_to_hbm [thread:$0]  (%p2076_p11), %s826_s4, 128, %s1983_s5, %s812_s29  }
 0x31c PF: > { %p1177_p4 = scmp.ge.s32.totalorder %s1605_s21, 2  ;;  %s837_s8 = sand.u32 1, %s1569_s12  }
 0x31d   : > { %p2077_p6 = scmp.ne.s32.totalorder %s2058_s6, 0  ;;  %s838_s23 = scalar_lea.sflag [#allocation7], %s837_s8 }
 0x31f   : > { %p1172_p9 = pnand %p1177_p4, %p2077_p6 }
 0x321   : > { %1564 = dma.done.wait (!%p1172_p9), %s838_s23, 128  }
 0x322   : > { %1566 = vsyncadd (!%p1172_p9), %s838_s23, 4294967168  ;;  %s17_s21 = sadd.s32 1, %s1605_s21   ;;  %s2078_s22 = sld [smem:[#allocation11_spill]] }
 0x323   : > { %p14_p3 = scmp.ge.s32.totalorder %s17_s21, 6   ;;  %s2079_s14 = sld [smem:[#allocation14_spill]] }
 0x324   : > { %s2080_s30 = sld [smem:[#allocation15_spill]]  ;;  %s2081_s7 = sld [smem:[#allocation12_spill]] }
 0x325   : > { %s2082_s10 = sld [smem:[#allocation13_spill]]  ;;  %s2083_s12 = smov %s1573_s13 }
 0x326   : > { %s2085_s15 = smov %s1585_s16  ;;  %s2087_s17 = smov %s1597_s19 }
 0x327   : > { %s2088_s18 = smov %s1601_s20  ;;  %16 = sbr.rel (!%p14_p3) target bundleno = 10 (0xa), region = 249 }
 0x328   : > { %s2084_s13 = smov %s2078_s22 }
 0x32a   : > { %s2086_s16 = smov %s2080_s30  ;;  %s2089_s19 = smov %s2081_s7 }
 0x32b   : > { %s2090_s20 = smov %s2082_s10 }
 0x32e   :  { %843 = vsyncpa [#allocation6], 1 }
 0x32f   :  { %845 = vsyncpa [#allocation6 + $0x1], 1 }
 0x330   :  { %846 = vsyncpa [#allocation7], 1 }
 0x331   :  { %848 = vsyncpa [#allocation7 + $0x1], 1 }

</bundles_post_ra>
